<compile_context>
chip_gen: v6e
topology: v6e:2x2x1
jax: 0.10.0
libtpu: 0.0.40
codegen_flags: <defaults>
</compile_context>

<pallas_src>
import math
import jax
import jax.numpy as jnp
from jax.experimental import pallas as pl
from jax.experimental.pallas import tpu as pltpu

_LANE = 128
_TARGET_STEPS = 8              # enough grid steps to keep the DMA pipeline busy
_MIN_STEP_BYTES = 128 * 1024   # amortize ~0.35us per-step overhead


def _vmem_budget_bytes():
    """Budget for the double-buffered per-step working set, generation aware.

    Kept well under the *default* scoped-VMEM limit on every generation
    (16 MiB v5e, 32 MiB v6e, 32-of-64 MiB v7x) so no vmem_limit_bytes override
    is required.
    """
    try:
        phys = pltpu.get_tpu_info().vmem_capacity_bytes
    except Exception:  # pragma: no cover - conservative fallback
        phys = 64 * 1024 * 1024
    return max(4 * 1024 * 1024, min(phys // 16, 8 * 1024 * 1024))


def _choose_tiles(N, hw, chans):
    """Pick (batch_tile, spatial_tile).  `chans` = d1 + d2 + out_f.

    Policy (from the perf review):
      * double-buffered per-step footprint <= generation-aware VMEM budget,
      * >= ~8 total grid steps (>= 2 when N == 1) so the pipeline / both v7x
        TensorCores have work, preferring >= 512-lane spatial tiles,
      * per-step DMAs >= ~128 KiB: fold batch elements when the image is small,
      * ragged tails via cdiv grids instead of full-extent fallback blocks.
    """
    budget = _vmem_budget_bytes()
    per_batch_bytes = 4 * chans * hw

    if N > 1 and per_batch_bytes < _MIN_STEP_BYTES:
        # Small image: fold several batch elements into each step.
        bt = -(-_MIN_STEP_BYTES // per_batch_bytes)            # ~128 KiB / step
        bt = max(bt, N // _TARGET_STEPS)                       # don't over-split
        bt = min(bt, N, max(1, budget // (2 * per_batch_bytes)))  # VMEM cap
        bt = min(bt, -(-N // 2))                               # >= 2 steps (v7x)
        return max(bt, 1), hw                                  # full spatial extent

    # One batch element per step; tile the spatial axis (multiples of 128,
    # ragged trailing tile allowed -- Pallas masks it).
    cap = max(_LANE, (budget // (2 * 4 * chans)) // _LANE * _LANE)
    hw_pad = -(-hw // _LANE) * _LANE
    want_tiles = max(2 if N == 1 else 1, -(-_TARGET_STEPS // N))
    t_for_steps = (-(-hw // want_tiles) + _LANE - 1) // _LANE * _LANE
    t_hw = min(cap, hw_pad, max(t_for_steps, 512))             # prefer >=512 lanes
    if N == 1 and hw_pad >= 2 * _LANE:
        # v7x: force at least two spatial tiles so both TensorCores get work.
        t_hw = min(t_hw, max(_LANE, (hw_pad // 2) // _LANE * _LANE))
    t_hw = max(t_hw, _LANE)
    if t_hw >= hw:
        t_hw = hw          # single tile: the full extent is always a legal block
    return 1, t_hw


def _skip_kernel(x1_ref, x2_ref, w1_ref, w2_ref, b_ref, o_ref):
    """out[b,o,s] = sum_d1 w1[o,d1]*x1[b,d1,s] + sum_d2 w2[o,d2]*x2[b,d2,s] + bias[o].

    x1_ref: (bt, d1, t)   x2_ref: (bt, d2, t)
    w1_ref: (out_f, d1)   w2_ref: (out_f, d2)   b_ref: (out_f, 1)
    o_ref : (bt, out_f, t)   -- lane-dense last (spatial) dim.
    Concat is never materialized; any activation cast is in-register (free vs DMA).
    """
    bt = x1_ref.shape[0]
    w1 = w1_ref[...].astype(jnp.float32)
    w2 = w2_ref[...].astype(jnp.float32)
    b = b_ref[...]                                    # (out_f, 1), f32

    if bt == 1:
        # Spatial-tiled path (one batch element per step): plain 2-D matmuls.
        x1 = x1_ref[0].astype(jnp.float32)            # (d1, t)
        x2 = x2_ref[0].astype(jnp.float32)            # (d2, t)
        acc = jnp.dot(w1, x1, preferred_element_type=jnp.float32)
        acc = acc + jnp.dot(w2, x2, preferred_element_type=jnp.float32)
        o_ref[0] = (acc + b).astype(o_ref.dtype)
    else:
        # Batch-folded path (small images): batched matmul so several batch
        # elements share one grid step / one large DMA.  Weight broadcast is
        # tiny (bt * out_f * d floats) and in-register.
        x1 = x1_ref[...].astype(jnp.float32)          # (bt, d1, t)
        x2 = x2_ref[...].astype(jnp.float32)          # (bt, d2, t)
        w1b = jnp.broadcast_to(w1, (bt,) + w1.shape)
        w2b = jnp.broadcast_to(w2, (bt,) + w2.shape)
        acc = jnp.einsum("bod,bds->bos", w1b, x1,
                         preferred_element_type=jnp.float32)
        acc = acc + jnp.einsum("bod,bds->bos", w2b, x2,
                               preferred_element_type=jnp.float32)
        o_ref[...] = (acc + b[None]).astype(o_ref.dtype)


def skip_connection(in1, in2, weight, bias, out_dtype=None):
    """SkipConnection.forward: concat([in1, in2], dim=1) -> 1x1 Conv2d(+bias).

    in1: (N, d1, H, W), in2: (N, d2, H, W) in NCHW (matching PyTorch).
    weight: (out_f, d1 + d2) -- the 1x1 conv kernel with the trailing 1x1 squeezed.
    bias:   (out_f,).
    Returns (N, out_f, H, W) in `out_dtype` (defaults to in1.dtype; pass
    jnp.bfloat16 to cut output HBM traffic if downstream precision allows).
    """
    N, d1, H, W = in1.shape
    N2, d2, H2, W2 = in2.shape
    assert (N, H, W) == (N2, H2, W2), "in1/in2 must share batch and spatial dims"
    out_f, in_f = weight.shape
    assert in_f == d1 + d2, "weight in_features must equal d1 + d2"
    out_dtype = in1.dtype if out_dtype is None else out_dtype

    hw = H * W
    bt, t_hw = _choose_tiles(N, hw, d1 + d2 + out_f)

    # Contiguous (free) reshapes only -- no transposes, no wrapper-side casts of
    # the activations.
    x1 = in1.reshape(N, d1, hw)
    x2 = in2.reshape(N, d2, hw)
    w1 = weight[:, :d1].astype(jnp.float32)            # (out_f, d1), resident
    w2 = weight[:, d1:].astype(jnp.float32)            # (out_f, d2), resident
    b = bias.reshape(out_f, 1).astype(jnp.float32)     # (out_f, 1),  resident

    # Ragged tails on both axes are handled by Pallas (partial blocks masked).
    grid = (pl.cdiv(N, bt), pl.cdiv(hw, t_hw))

    out_flat = pl.pallas_call(
        _skip_kernel,
        out_shape=jax.ShapeDtypeStruct((N, out_f, hw), out_dtype),
        grid_spec=pltpu.PrefetchScalarGridSpec(
            num_scalar_prefetch=0,
            grid=grid,
            in_specs=[
                pl.BlockSpec((bt, d1, t_hw), lambda n, j: (n, 0, j)),
                pl.BlockSpec((bt, d2, t_hw), lambda n, j: (n, 0, j)),
                pl.BlockSpec((out_f, d1), lambda n, j: (0, 0)),   # resident weights
                pl.BlockSpec((out_f, d2), lambda n, j: (0, 0)),
                pl.BlockSpec((out_f, 1), lambda n, j: (0, 0)),
            ],
            out_specs=pl.BlockSpec((bt, out_f, t_hw), lambda n, j: (n, 0, j)),
        ),
        compiler_params=pltpu.CompilerParams(
            # Both grid axes are independent -> v7x's two TensorCores split them.
            dimension_semantics=("parallel", "parallel"),
        ),
    )(x1, x2, w1, w2, b)

    # Contiguous (free) reshape back to NCHW.
    return out_flat.reshape(N, out_f, H, W)


def init_params(key, in_features, out_features):
    """Xavier-uniform weight, zero bias -- matches nn.init.xavier_uniform_/zeros_."""
    bound = math.sqrt(6.0 / (in_features + out_features))
    weight = jax.random.uniform(
        key, (out_features, in_features), minval=-bound, maxval=bound,
        dtype=jnp.float32,
    )
    bias = jnp.zeros((out_features,), dtype=jnp.float32)
    return weight, bias


def _reference(in1, in2, weight, bias):
    """Pure-JAX reference: concat + 1x1 conv (per-pixel matmul)."""
    x_cat = jnp.concatenate([in1, in2], axis=1)                  # (N, C, H, W)
    return jnp.einsum("nchw,oc->nohw", x_cat, weight) + bias[None, :, None, None]


if __name__ == "__main__":
    root = jax.random.PRNGKey(0)

    def run_case(key, N, d1, d2, out_features, m):
        k1, k2, kw, kb = jax.random.split(key, 4)
        in1 = jax.random.normal(k1, (N, d1, m, m), dtype=jnp.float32)
        in2 = jax.random.normal(k2, (N, d2, m, m), dtype=jnp.float32)
        weight, bias = init_params(kw, d1 + d2, out_features)
        # Non-zero bias so the bias-add path is actually exercised.
        bias = 0.1 * jax.random.normal(kb, (out_features,), dtype=jnp.float32)
        out = skip_connection(in1, in2, weight, bias)
        jax.block_until_ready(out)
        ref = _reference(in1, in2, weight, bias)
        assert out.shape == (N, out_features, m, m)
        assert jnp.allclose(out, ref, atol=1e-5, rtol=1e-5), (
            f"mismatch: N={N} d1={d1} d2={d2} out_f={out_features} m={m}")

    keys = jax.random.split(root, 3)
    # 1) Canonical module shape (bt=1, single spatial tile per batch element).
    run_case(keys[0], N=2, d1=4, d2=4, out_features=8, m=16)
    # 2) Many small images -> exercises the batch-folded (bt>1) path.
    run_case(keys[1], N=16, d1=3, d2=5, out_features=8, m=16)
    # 3) N=1, non-multiple-of-128 spatial extent -> >=2 ragged spatial tiles.
    run_case(keys[2], N=1, d1=2, d2=3, out_features=4, m=40)

    print("KERNEL_OK")
</pallas_src>

<mosaic_0001>
module attributes {stable_mosaic.version = 11 : i64} {
  func.func @_skip_kernel(%arg0: i32, %arg1: i32, %arg2: memref<1x4x256xf32, #tpu.memory_space<vmem>>, %arg3: memref<1x4x256xf32, #tpu.memory_space<vmem>>, %arg4: memref<8x4xf32, #tpu.memory_space<vmem>>, %arg5: memref<8x4xf32, #tpu.memory_space<vmem>>, %arg6: memref<8x1xf32, #tpu.memory_space<vmem>>, %arg7: memref<1x8x256xf32, #tpu.memory_space<vmem>>) attributes {dimension_semantics = [#tpu.dimension_semantics<parallel>, #tpu.dimension_semantics<parallel>], iteration_bounds = array<i64: 2, 1>, scalar_prefetch = 0 : i64, scratch_operands = 0 : i64, tpu.core_type = #tpu.core_type<tc>, window_params = [{transform_indices = @transform_0, window_bounds = array<i64: 1, 4, 256>}, {transform_indices = @transform_1, window_bounds = array<i64: 1, 4, 256>}, {pipeline_mode = #tpu.pipeline_mode<synchronous>, transform_indices = @transform_2, window_bounds = array<i64: 8, 4>}, {pipeline_mode = #tpu.pipeline_mode<synchronous>, transform_indices = @transform_3, window_bounds = array<i64: 8, 4>}, {pipeline_mode = #tpu.pipeline_mode<synchronous>, transform_indices = @transform_4, window_bounds = array<i64: 8, 1>}, {transform_indices = @transform_5, window_bounds = array<i64: 1, 8, 256>}]} {
    %c0 = arith.constant 0 : index
    %c0_0 = arith.constant 0 : index
    %0 = vector.load %arg4[%c0, %c0_0] : memref<8x4xf32, #tpu.memory_space<vmem>>, vector<8x4xf32>
    %c0_1 = arith.constant 0 : index
    %c0_2 = arith.constant 0 : index
    %1 = vector.load %arg5[%c0_1, %c0_2] : memref<8x4xf32, #tpu.memory_space<vmem>>, vector<8x4xf32>
    %c0_3 = arith.constant 0 : index
    %c0_4 = arith.constant 0 : index
    %2 = vector.load %arg6[%c0_3, %c0_4] : memref<8x1xf32, #tpu.memory_space<vmem>>, vector<8x1xf32>
    %c0_5 = arith.constant 0 : index
    %c0_6 = arith.constant 0 : index
    %c0_7 = arith.constant 0 : index
    %3 = vector.load %arg2[%c0_5, %c0_6, %c0_7] : memref<1x4x256xf32, #tpu.memory_space<vmem>>, vector<1x4x256xf32>
    %4 = vector.shape_cast %3 : vector<1x4x256xf32> to vector<4x256xf32>
    %c0_8 = arith.constant 0 : index
    %c0_9 = arith.constant 0 : index
    %c0_10 = arith.constant 0 : index
    %5 = vector.load %arg3[%c0_8, %c0_9, %c0_10] : memref<1x4x256xf32, #tpu.memory_space<vmem>>, vector<1x4x256xf32>
    %6 = vector.shape_cast %5 : vector<1x4x256xf32> to vector<4x256xf32>
    %cst = arith.constant dense<0.000000e+00> : vector<8x256xf32>
    %7 = tpu.matmul %0, %4, %cst {dimension_numbers = #tpu.dot_dimension_numbers<[1], [0], [0], [1], [0, 0, 1, 1], [], []>} : vector<8x4xf32>, vector<4x256xf32>, vector<8x256xf32> -> vector<8x256xf32>
    %cst_11 = arith.constant dense<0.000000e+00> : vector<8x256xf32>
    %8 = tpu.matmul %1, %6, %cst_11 {dimension_numbers = #tpu.dot_dimension_numbers<[1], [0], [0], [1], [0, 0, 1, 1], [], []>} : vector<8x4xf32>, vector<4x256xf32>, vector<8x256xf32> -> vector<8x256xf32>
    %9 = arith.addf %7, %8 : vector<8x256xf32>
    %10 = vector.broadcast %2 : vector<8x1xf32> to vector<8x256xf32>
    %11 = arith.addf %9, %10 : vector<8x256xf32>
    %c0_12 = arith.constant 0 : index
    %c0_13 = arith.constant 0 : index
    %c0_14 = arith.constant 0 : index
    %12 = vector.load %arg7[%c0_12, %c0_13, %c0_14] : memref<1x8x256xf32, #tpu.memory_space<vmem>>, vector<1x8x256xf32>
    %13 = vector.shape_cast %12 : vector<1x8x256xf32> to vector<8x256xf32>
    %14 = vector.shape_cast %11 : vector<8x256xf32> to vector<1x8x256xf32>
    tpu.vector_store %arg7[%c0_12, %c0_13, %c0_14], %14 {strides = array<i32>} : memref<1x8x256xf32, #tpu.memory_space<vmem>>, vector<1x8x256xf32>,
    return
  }
  func.func @transform_0(%arg0: i32, %arg1: i32) -> (i32, i32, i32) {
    %c0_i32 = arith.constant 0 : i32
    %c0_i32_0 = arith.constant 0 : i32
    return %arg0, %c0_i32, %arg1 : i32, i32, i32
  }
  func.func @transform_1(%arg0: i32, %arg1: i32) -> (i32, i32, i32) {
    %c0_i32 = arith.constant 0 : i32
    %c0_i32_0 = arith.constant 0 : i32
    return %arg0, %c0_i32, %arg1 : i32, i32, i32
  }
  func.func @transform_2(%arg0: i32, %arg1: i32) -> (i32, i32) {
    %c0_i32 = arith.constant 0 : i32
    %c0_i32_0 = arith.constant 0 : i32
    %c0_i32_1 = arith.constant 0 : i32
    return %c0_i32, %c0_i32_0 : i32, i32
  }
  func.func @transform_3(%arg0: i32, %arg1: i32) -> (i32, i32) {
    %c0_i32 = arith.constant 0 : i32
    %c0_i32_0 = arith.constant 0 : i32
    %c0_i32_1 = arith.constant 0 : i32
    return %c0_i32, %c0_i32_0 : i32, i32
  }
  func.func @transform_4(%arg0: i32, %arg1: i32) -> (i32, i32) {
    %c0_i32 = arith.constant 0 : i32
    %c0_i32_0 = arith.constant 0 : i32
    %c0_i32_1 = arith.constant 0 : i32
    return %c0_i32, %c0_i32_0 : i32, i32
  }
  func.func @transform_5(%arg0: i32, %arg1: i32) -> (i32, i32, i32) {
    %c0_i32 = arith.constant 0 : i32
    %c0_i32_0 = arith.constant 0 : i32
    return %arg0, %c0_i32, %arg1 : i32, i32, i32
  }
}

</mosaic_0001>

<bundles_post_ra>
// kernel: tpu_custom_call.1
= control target key start
LH: loop header
LB: loop body
LE: loop exit
PB: predicated region body
PF: predicated region fallthrough
CT: control target
= control target key end

     0   :  { %10 = vsyncpa [#allocation3], 0  ;;  %s883_s0 = inlined_call_operand.vmem [shape: f32[2,4,256], index: 0, kind: input, shape index: {}]   ;;  %s884_s1 = inlined_call_operand.vmem [shape: f32[2,4,256], index: 1, kind: input, shape index: {}]   ;;  %s885_s2 = inlined_call_operand.vmem [shape: f32[8,4], index: 2, kind: input, shape index: {}]   ;;  %s886_s3 = inlined_call_operand.vmem [shape: f32[8,4], index: 3, kind: input, shape index: {}]   ;;  %s887_s4 = inlined_call_operand.vmem [shape: f32[8,1], index: 4, kind: input, shape index: {}]   ;;  %s888_s5 = inlined_call_operand.hbm [shape: f32[2,8,256], index: 5, kind: output, shape index: {}]  }
   0x1   :  { %12 = vsyncpa [#allocation3 + $0x1], 0  ;;  %s772_s18 = smov 0   ;;  %s774_s19 = smov 0  }
   0x2   :  { %s776_s20 = smov 0   ;;  %s778_s21 = smov 0  }
   0x3   :  { %s780_s22 = smov 0   ;;  %s782_s23 = smov 0  }
   0x4 LB: > { %s577_s24 = sadd.s32 4294967295, %s737_s23   ;;  %s578_s25 = sadd.s32 4294967294, %s737_s23   ;;  %s737_s23 = sphi %s782_s23, %s18_s23   ;;  %s733_s22 = sphi %s780_s22, %s895_s22   ;;  %s729_s21 = sphi %s778_s21, %s894_s21   ;;  %s725_s20 = sphi %s776_s20, %s893_s20   ;;  %s721_s19 = sphi %s774_s19, %s892_s19   ;;  %s717_s18 = sphi %s772_s18, %s891_s18  }
   0x5   : > { %s30_s26 = sadd.s32 1, %s733_s22  ;;  %s158_s27 = sadd.s32 1, %s725_s20 }
   0x6   : > { %p32_p0 = scmp.ge.s32.totalorder %s30_s26, 2  ;;  %p168_p1 = scmp.ne.s32.totalorder %s725_s20, %s721_s19 }
   0x7   : > { %p169_p2 = scmp.eq.s32.totalorder %s577_s24, 1  ;;  %p174_p3 = scmp.ne.s32.totalorder %s721_s19, %s717_s18 }
   0x8   : > { %s897_s26 = smov (%p32_p0, %s30_s26), 0  ;;  %p175_p5 = scmp.eq.s32.totalorder %s578_s25, 1 }
   0x9   : > { %p812_p4 = por %p169_p2, %p168_p1  ;;  %s153_s29 = ssub.s32 %s733_s22, %s897_s26 }
   0xa   : > { %p581_p6 = scmp.ge.s32.totalorder %s737_s23, 1  ;;  %p156_p7 = scmp.eq.s32.totalorder %s153_s29, 0 }
   0xb   : > { %p819_p8 = por %p175_p5, %p174_p3  ;;  %p228_p9 = scmp.lt.s32.totalorder %s737_s23, 3 }
   0xc   : > { %s825_s6 = scalar_select %p156_p7, %s725_s20, %s158_s27  }
   0xd   : > { %p229_p10 = pnand %p581_p6, %p228_p9 }
   0xe   : > { %p270_p11 = scmp.lt.s32.totalorder (!%p229_p10), %s729_s21, 1  ;;  %s266_s29 = sand.u32 (!%p229_p10), 1, %s721_s19  }
   0xf   : > { %232 = sbr.rel (%p229_p10) target bundleno = 242 (0xf2), region = 40  ;;  %s582_s7 = sshll.u32 (!%p229_p10), %s266_s29, 4 }
  0x10   : > { %s600_s8 = sshll.u32 (!%p229_p10), %s729_s21, 8  ;;  %s467_s14 = scalar_lea.sflag (!%p229_p10), [#allocation3], %s266_s29 }
  0x14   : > { %v739_v0 = vmov 0.0   ;;  %v292_v1 = vld [vmem:[%s887_s4] sm:$0xff]  ;;  %s271_s9 = scalar_select %p270_p11, %s729_s21, 1  ;;  %v740_v2 = vmov 0   ;;  %vm301_vm0 = vcmask 1043456   ;;  %vm297_vm1 = vcmask 31744  }
  0x15   : > { %370 = vmatprep.mubr.f32.mxu0 %v739_v0  ;;  %450 = vmatprep.mubr.f32.mxu1 %v739_v0  ;;  %v291_v7 = vld [vmem:[%s886_s3] sm:$0xff] }
  0x16   : > { %658 = vset.pattern.permute.xlu0 %v740_v2  ;;  %s598_s10 = sshll.u32 %s271_s9, 3  ;;  %v290_v8 = vld [vmem:[%s885_s2] sm:$0xff]  ;;  %s268_s9 = scalar_lea.vmem [#allocation2], %s582_s7 }
  0x17   : > { %459 = vperm.xlu0 %658, %v292_v1   ;;  %s287_s13 = scalar_lea.vmem %s884_s1, %s598_s10  ;;  %s277_s16 = scalar_lea.vmem %s883_s0, %s598_s10 }
  0x18   : > { %v294_v3 = vld [vmem:[%s287_s13] sm:$0xff]  ;;  %s483_s10 = sshll.u32 %s268_s9, 4  ;;  %s481_s13 = scalar_lea.hbm %s888_s5, %s600_s8  ;;  %s484_s10 = int_to_ptr.vmem [resolvable:$true] %s483_s10 }
  0x19   : > { %v293_v4 = vld [vmem:[%s277_s16] sm:$0xff]  ;;  %v296_v5 = vcombine.high %v294_v3, %v294_v3  ;;  %s661_s15 = scalar_lea.vmem %s484_s10, 256  ;;  %s741_s16 = smov [#allocation2]  }
  0x1a   : > { %v378_v6 = vcombine.high %v293_v4, %v293_v4  ;;  %p662_p12 = scmp.ne.s32.totalorder %s484_s10, %s661_s15  ;;  %s665_s21 = sshll.u32 %s741_s16, 4  ;;  %s666_s21 = int_to_ptr.vmem [resolvable:$false] %s665_s21 }
  0x1b   : > { %587 = vmatprep.subr.msk.mxu0 %vm301_vm0, %v296_v5  ;;  %s667_s17 = scalar_lea.vmem %s666_s21, 512  ;;  %p668_p1 = scmp.lt.s32.totalorder %s484_s10, %s666_s21 }
  0x1c   : > { %590 = vmatprep.subr.msk.mxu1 %vm301_vm0, %v378_v6  ;;  %588 = vmatpush1.msk.msra.mxu0 %vm301_vm0, %v294_v3  ;;  %p663_p13 = pnand %p662_p12, %p812_p4  ;;  %p669_p2 = scmp.lt.s32.totalorder %s667_s17, %s661_s15 }
  0x1d   : > { %591 = vmatpush1.msk.msra.mxu1 %vm301_vm0, %v293_v4  ;;  %589 = vmatmul.mubr.msk.f32.vlgmr.msra.gmra.mxu0 %vm297_vm1, %v291_v7 }
  0x1e   : > { %592 = vmatmul.mubr.msk.f32.vlgmr.msra.gmra.mxu1 %vm297_vm1, %v290_v8  ;;  %p664_p0 = pneg %p663_p13  ;;  %p670_p3 = por %p669_p2, %p668_p1 }
  0x20   : > { %p671_p5 = pnand %p670_p3, %p664_p0 }
  0x92   : > { %v460_v9 = vpop.permute.xlu0 %459 }
  0xdd   : > { %v372_v10 = vpop.f32.mrf.mxu0 }
  0xde   : > { %v452_v11 = vpop.f32.mrf.mxu1 }
  0xdf   : > { %v453_v12 = vadd.f32 %v452_v11, %v372_v10  ;;  %v374_v13 = vpop.f32.mrf.mxu0 }
  0xe0   : > { %v454_v14 = vpop.f32.mrf.mxu1 }
  0xe1   : > { %v462_v15 = vadd.f32 %v460_v9, %v453_v12  ;;  %v455_v16 = vadd.f32 %v454_v14, %v374_v13 }
  0xe3   : > { %464 = vst [vmem:[%s268_s9] sm:$0xff] %v462_v15  ;;  %v463_v17 = vadd.f32 %v460_v9, %v455_v16 }
  0xe5   : > { %465 = vst [vmem:[%s268_s9 + $0x8] sm:$0xff] %v463_v17 }
  0xe6   : > { %674 = shalt.err (!%p671_p5)
}
  0xe7   : > { %s675_s24 = scalar_lea.hbm %s481_s13, 256  ;;  %s679_s29 = scalar_lea.hbm %s888_s5, 512 }
  0xe8   : > { %p676_p6 = scmp.ne.s32.totalorder %s481_s13, %s675_s24  ;;  %p680_p10 = scmp.lt.s32.totalorder %s481_s13, %s888_s5 }
  0xe9   : > { %p681_p11 = scmp.lt.s32.totalorder %s679_s29, %s675_s24 }
  0xea   : > { %p677_p7 = pnand %p676_p6, %p812_p4 }
  0xeb   : > { %p682_p12 = por %p681_p11, %p680_p10 }
  0xec   : > { %p678_p9 = pneg %p677_p7 }
  0xee   : > { %p683_p13 = pnand %p682_p12, %p678_p9 }
  0xf0   : > { %686 = shalt.err (!%p683_p13)
}
  0xf1   : > { %601 = dma.vmem_to_hbm [thread:$0]  (%p812_p4), %s484_s10, 256, %s481_s13, %s467_s14  }
  0xf2 PF: > { %p607_p0 = scmp.ge.s32.totalorder %s737_s23, 2  ;;  %s495_s9 = sand.u32 1, %s717_s18  }
  0xf3   : > { %s496_s11 = scalar_lea.sflag [#allocation3], %s495_s9 }
  0xf4   : > { %p604_p1 = pnand %p607_p0, %p819_p8 }
  0xf6   : > { %p605_p2 = pneg %p604_p1 }
  0xf8   : > { %712 = dma.done.wait (%p605_p2), %s496_s11, 256  }
  0xf9   : > { %714 = vsyncadd (%p605_p2), %s496_s11, 4294967040  ;;  %s18_s23 = sadd.s32 1, %s737_s23   ;;  %s891_s18 = smov %s721_s19 }
  0xfa   : > { %p15_p3 = scmp.ge.s32.totalorder %s18_s23, 4   ;;  %s892_s19 = smov %s725_s20 }
  0xfb   : > { %s893_s20 = smov %s825_s6  ;;  %s894_s21 = smov %s733_s22 }
  0xfc   : > { %s895_s22 = smov %s897_s26  ;;  %17 = sbr.rel (!%p15_p3) target bundleno = 4 (0x4), region = 78 }
 0x101   :  { %501 = vsyncpa [#allocation3], 1 }
 0x102   :  { %503 = vsyncpa [#allocation3 + $0x1], 1 }

</bundles_post_ra>
